<compile_context>
chip_gen: v6e
topology: v6e:2x2x1
jax: 0.10.0
libtpu: 0.0.40
codegen_flags: <defaults>
</compile_context>

<pallas_src>
import numpy as np

import jax
import jax.numpy as jnp
from jax import lax
from jax.experimental import pallas as pl
from jax.experimental.pallas import tpu as pltpu

_LANES = 128


def _round_up(x, m):
    return ((x + m - 1) // m) * m


def _make_clip_kernel(width, height, dtype):
    """Build the clamp kernel; W/H/dtype are static Python scalars."""
    if jnp.issubdtype(dtype, jnp.floating):
        neg_big = float("-inf")                       # "no lower bound" for x2/y2
    else:
        neg_big = int(np.iinfo(np.dtype(dtype)).min)

    def kernel(x_ref, o_ref):
        # Row-major flat index i of [B, N, 4] has coordinate i % 4; since
        # 128 % 4 == 0, lane l always holds coordinate l % 4 (row-independent).
        lane = lax.broadcasted_iota(jnp.int32, (1, _LANES), 1)
        coord = lane & 3
        lo = jnp.where(coord < 2,
                       jnp.asarray(0, dtype), jnp.asarray(neg_big, dtype))
        hi = jnp.where((coord & 1) == 0,
                       jnp.asarray(width, dtype), jnp.asarray(height, dtype))
        o_ref[...] = jnp.minimum(jnp.maximum(x_ref[...], lo), hi)

    return kernel


def clip_boxes(boxes, img, *, max_tile_rows=4096):
    """boxes: [B, N, 4] (x1, y1, x2, y2); img: [B, C, H, W] (shape only)."""
    batch_size, _num_channels, height, width = img.shape
    b, n, c4 = boxes.shape
    assert c4 == 4 and b == batch_size
    dtype = boxes.dtype
    width, height = int(width), int(height)

    if not jnp.issubdtype(dtype, jnp.floating):
        assert np.iinfo(np.dtype(dtype)).max >= max(width, height), (
            "boxes dtype cannot represent the clamp bounds W/H")

    total = b * n * 4
    if total == 0:
        return boxes                                   # nothing to clamp

    # ---- lane-dense slab: [B, N, 4] -> [rows, 128] --------------------------
    rows = -(-total // _LANES)                         # cdiv
    pad = rows * _LANES - total                        # <= 127 elements
    if pad == 0:
        slab = boxes.reshape(rows, _LANES)             # fast path: no extra HBM pass
    else:
        slab = jnp.pad(boxes.reshape(-1), (0, pad)).reshape(rows, _LANES)

    # ---- tiling --------------------------------------------------------------
    itemsize = np.dtype(dtype).itemsize
    sublane = {4: 8, 2: 16, 1: 32}.get(itemsize, 8)    # packed-tile row multiple
    if rows <= sublane:
        tile_rows = rows                               # single full-extent block
    else:
        # Target >= 2 grid steps so v7x's 2 TensorCores both get work.
        half = _round_up(-(-rows // 2), sublane)
        tile_rows = min(_round_up(max_tile_rows, sublane), half)
    grid = -(-rows // tile_rows)                       # ragged last block is masked

    out = pl.pallas_call(
        _make_clip_kernel(width, height, dtype),
        out_shape=jax.ShapeDtypeStruct((rows, _LANES), dtype),
        grid_spec=pltpu.PrefetchScalarGridSpec(
            num_scalar_prefetch=0,
            grid=(grid,),
            in_specs=[pl.BlockSpec((tile_rows, _LANES), lambda i: (i, 0))],
            out_specs=pl.BlockSpec((tile_rows, _LANES), lambda i: (i, 0)),
        ),
        # Semantically in-place (like the PyTorch module): alias slab -> out.
        input_output_aliases={0: 0},
        cost_estimate=pl.CostEstimate(
            flops=2 * rows * _LANES,
            transcendentals=0,
            bytes_accessed=2 * rows * _LANES * itemsize),
        compiler_params=pltpu.CompilerParams(
            dimension_semantics=("parallel",),
            vmem_limit_bytes=32 * 1024 * 1024),
    )(slab)

    if pad == 0:
        return out.reshape(b, n, 4)
    return out.reshape(-1)[:total].reshape(b, n, 4)


if __name__ == "__main__":
    key = jax.random.PRNGKey(0)

    B, C, H, W = 2, 4, 16, 16
    img = jnp.zeros((B, C, H, W), dtype=jnp.float32)

    def reference(bx, h, w):
        r = bx
        r = r.at[:, :, 0].set(jnp.clip(bx[:, :, 0], 0.0, float(w)))
        r = r.at[:, :, 1].set(jnp.clip(bx[:, :, 1], 0.0, float(h)))
        r = r.at[:, :, 2].set(jnp.minimum(bx[:, :, 2], float(w)))
        r = r.at[:, :, 3].set(jnp.minimum(bx[:, :, 3], float(h)))
        return r

    ok = True
    # N=8 exercises the (<=127 elem) pad path; N=32 exercises the no-pad fast path.
    for n_boxes in (8, 32):
        k = jax.random.fold_in(key, n_boxes)
        # Values both below 0 and above W/H so every clamp branch is exercised.
        boxes = jax.random.uniform(
            k, (B, n_boxes, 4), dtype=jnp.float32, minval=-10.0, maxval=30.0)
        out = clip_boxes(boxes, img)
        jax.block_until_ready(out)
        ok = ok and bool(jnp.allclose(out, reference(boxes, H, W)))

    assert ok, "mismatch vs reference"
    print("KERNEL_OK")
</pallas_src>

<mosaic_0001>
module attributes {stable_mosaic.version = 11 : i64} {
  func.func @kernel(%arg0: i32, %arg1: memref<1x128xf32, #tpu.memory_space<vmem>>, %arg2: memref<1x128xf32, #tpu.memory_space<vmem>>) attributes {dimension_semantics = [#tpu.dimension_semantics<parallel>], iteration_bounds = array<i64: 1>, scalar_prefetch = 0 : i64, scratch_operands = 0 : i64, tpu.core_type = #tpu.core_type<tc>, window_params = [{transform_indices = @transform_0, window_bounds = array<i64: 1, 128>}, {transform_indices = @transform_1, window_bounds = array<i64: 1, 128>}]} {
    %0 = tpu.iota {dimensions = array<i32: 1>} : vector<1x128xi32>
    %c3_i32 = arith.constant 3 : i32
    %1 = vector.broadcast %c3_i32 : i32 to vector<1x128xi32>
    %2 = arith.andi %0, %1 : vector<1x128xi32>
    %c2_i32 = arith.constant 2 : i32
    %3 = vector.broadcast %c2_i32 : i32 to vector<1x128xi32>
    %4 = arith.cmpi slt, %2, %3 : vector<1x128xi32>
    %cst = arith.constant 0.000000e+00 : f32
    %cst_0 = arith.constant 0xFF800000 : f32
    %5 = vector.broadcast %cst : f32 to vector<1x128xf32>
    %6 = vector.broadcast %cst_0 : f32 to vector<1x128xf32>
    %7 = arith.select %4, %5, %6 : vector<1x128xi1>, vector<1x128xf32>
    %c1_i32 = arith.constant 1 : i32
    %8 = vector.broadcast %c1_i32 : i32 to vector<1x128xi32>
    %9 = arith.andi %2, %8 : vector<1x128xi32>
    %c0_i32 = arith.constant 0 : i32
    %10 = vector.broadcast %c0_i32 : i32 to vector<1x128xi32>
    %11 = arith.cmpi eq, %9, %10 : vector<1x128xi32>
    %cst_1 = arith.constant 1.600000e+01 : f32
    %cst_2 = arith.constant 1.600000e+01 : f32
    %12 = vector.broadcast %cst_1 : f32 to vector<1x128xf32>
    %13 = vector.broadcast %cst_2 : f32 to vector<1x128xf32>
    %14 = arith.select %11, %12, %13 : vector<1x128xi1>, vector<1x128xf32>
    %c0 = arith.constant 0 : index
    %c0_3 = arith.constant 0 : index
    %15 = vector.load %arg1[%c0, %c0_3] : memref<1x128xf32, #tpu.memory_space<vmem>>, vector<1x128xf32>
    %16 = arith.maximumf %15, %7 : vector<1x128xf32>
    %17 = arith.minimumf %16, %14 : vector<1x128xf32>
    %c0_4 = arith.constant 0 : index
    %c0_5 = arith.constant 0 : index
    %18 = vector.load %arg2[%c0_4, %c0_5] : memref<1x128xf32, #tpu.memory_space<vmem>>, vector<1x128xf32>
    tpu.vector_store %arg2[%c0_4, %c0_5], %17 {strides = array<i32>} : memref<1x128xf32, #tpu.memory_space<vmem>>, vector<1x128xf32>,
    return
  }
  func.func @transform_0(%arg0: i32) -> (i32, i32) {
    %c0_i32 = arith.constant 0 : i32
    %c0_i32_0 = arith.constant 0 : i32
    return %arg0, %c0_i32 : i32, i32
  }
  func.func @transform_1(%arg0: i32) -> (i32, i32) {
    %c0_i32 = arith.constant 0 : i32
    %c0_i32_0 = arith.constant 0 : i32
    return %arg0, %c0_i32 : i32, i32
  }
}

</mosaic_0001>

<bundles_post_ra>
// kernel: tpu_custom_call.1
= control target key start
LH: loop header
LB: loop body
LE: loop exit
PB: predicated region body
PF: predicated region fallthrough
CT: control target
= control target key end

     0   :  { %6 = vsyncpa [#allocation3], 0  ;;  %s111_s0 = inlined_call_operand.hbm [shape: f32[1,128], index: 0, kind: input, shape index: {}, may-alias: {0,1}]   ;;  %s112_s1 = inlined_call_operand.hbm [shape: f32[1,128], index: 1, kind: output, shape index: {}, may-alias: {0,1}]  }
   0x1   :  { %7 = vsyncpa [#allocation4], 0  ;;  %s92_s6 = smov [#allocation2]  }
   0x2   :  { %s14_s7 = sshll.u32 %s92_s6, 4  ;;  %s15_s7 = int_to_ptr.vmem [resolvable:$true] %s14_s7 }
   0x3   :  { %s56_s8 = scalar_lea.vmem %s15_s7, 16  ;;  %s60_s9 = scalar_lea.vmem %s15_s7, 32 }
   0x4   :  { %p57_p0 = scmp.ne.s32.totalorder %s15_s7, %s56_s8  ;;  %p61_p1 = scmp.lt.s32.totalorder %s15_s7, %s15_s7 }
   0x5   :  { %p62_p2 = scmp.lt.s32.totalorder %s60_s9, %s56_s8 }
   0x7   :  { %p63_p3 = por %p62_p2, %p61_p1 }
   0x9   :  { %p64_p4 = pnand %p63_p3, %p57_p0 }
   0xb   :  { %67 = shalt.err (!%p64_p4)
}
   0xc   :  { %17 = dma.hbm_to_vmem [thread:$0]  %s111_s0, 16, %s15_s7, [#allocation3]  }
   0xd   :  { %88 = dma.done.wait [#allocation3], 16  }
   0xe   :  { %89 = vsyncadd [#allocation3], 4294967280  ;;  %v21_v0 = vlaneseq  ;;  %v93_v3 = vmov -inf   ;;  %v26_v5 = vld [vmem:[#allocation2] sm:$0x1]  ;;  %s94_s12 = smov [#allocation5]  }
   0xf   :  { %s36_s13 = sshll.u32 %s94_s12, 4  ;;  %s37_s13 = int_to_ptr.vmem [resolvable:$true] %s36_s13 }
  0x10   :  { %v22_v1 = vand.u32 127, %v21_v0  ;;  %s68_s14 = scalar_lea.vmem %s37_s13, 16  ;;  %s72_s15 = scalar_lea.vmem %s37_s13, 32 }
  0x11   :  { %p69_p5 = scmp.ne.s32.totalorder %s37_s13, %s68_s14  ;;  %p73_p6 = scmp.lt.s32.totalorder %s37_s13, %s37_s13 }
  0x12   :  { %v23_v2 = vand.u32 3, %v22_v1  ;;  %p74_p7 = scmp.lt.s32.totalorder %s72_s15, %s68_s14 }
  0x14   :  { %vm24_vm0 = vcmp.lt.s32.totalorder %v23_v2, 2  ;;  %p75_p8 = por %p74_p7, %p73_p6 }
  0x15   :  { %v25_v4 = vsel %vm24_vm0, 0.0, %v93_v3 }
  0x16   :  { %v27_v6 = vmax.f32 %v26_v5, %v25_v4  ;;  %p76_p9 = pnand %p75_p8, %p69_p5 }
  0x18   :  { %v28_v7 = vmin.f32 %v27_v6, 16.0 }
  0x1a   :  { %29 = vst [vmem:[#allocation5] sm:$0x1] %v28_v7 }
  0x1b   :  { %79 = shalt.err (!%p76_p9)
}
  0x1c   :  { %39 = dma.vmem_to_hbm [thread:$0]  %s37_s13, 16, %s112_s1, [#allocation4]  }
  0x1d   :  { %90 = dma.done.wait [#allocation4], 16  }
  0x1e   :  { %91 = vsyncadd [#allocation4], 4294967280 }
  0x1f   :  { %43 = vsyncpa [#allocation3], 1 }
  0x20   :  { %44 = vsyncpa [#allocation4], 1 }

</bundles_post_ra>
